<compile_context>
chip_gen: v7x
topology: tpu7x:2x2x1
jax: 0.10.0
libtpu: 0.0.40
codegen_flags: <defaults>
</compile_context>

<pallas_src>
import jax
import jax.numpy as jnp
from jax.experimental import pallas as pl
from jax.experimental.pallas import tpu as pltpu


def _round_up(x, m):
    return ((x + m - 1) // m) * m


def actor_net_kernel(x_ref, w1_ref, b1_ref, w2_ref, b2_ref, out_ref):
    x = x_ref[...]
    # fc1 + ReLU (f32 MXU accumulate); hidden is zero-padded to 128 lanes on
    # the host so h is lane-dense and fc2's contraction dim is 128-aligned.
    h = jnp.dot(x, w1_ref[...], preferred_element_type=jnp.float32) + b1_ref[...]
    h = jnp.maximum(h, 0.0)
    # action_linear with compact N = output_dim (padded hidden rows are zero
    # in w2, so they contribute nothing).
    s = jnp.dot(h, w2_ref[...], preferred_element_type=jnp.float32) + b2_ref[...]
    # numerically stable softmax over the last dim
    s = s - jnp.max(s, axis=-1, keepdims=True)
    e = jnp.exp(s)
    denom = jnp.sum(e, axis=-1, keepdims=True)
    inv = pl.reciprocal(denom, approx=False)  # approx=True -> EUP, ~1e-3 tol
    out_ref[...] = (e * inv).astype(out_ref.dtype)


def actor_net_forward(x, w1, b1, w2, b2, *, block_b=2048):
    """x: (B, input_dim) f32; w1: (in, hid); b1: (1, hid) or (hid,);
    w2: (hid, out); b2: (1, out) or (out,).  Returns softmax probs (B, out)."""
    B, input_dim = x.shape
    hidden_dim = w1.shape[1]
    output_dim = w2.shape[1]

    # --- host-side weight prep (one-time, tiny) -----------------------------
    # Zero-pad hidden to a multiple of 128: numerically identical, lane-dense h.
    h_pad = _round_up(max(hidden_dim, 128), 128)
    w1p = jnp.zeros((input_dim, h_pad), jnp.float32).at[:, :hidden_dim].set(
        w1.astype(jnp.float32))
    b1p = jnp.zeros((1, h_pad), jnp.float32).at[:, :hidden_dim].set(
        b1.reshape(1, hidden_dim).astype(jnp.float32))
    w2p = jnp.zeros((h_pad, output_dim), jnp.float32).at[:hidden_dim, :].set(
        w2.astype(jnp.float32))
    b2r = b2.reshape(1, output_dim).astype(jnp.float32)

    # --- batch tile ----------------------------------------------------------
    # Large tiles amortize the ~0.35us per-grid-step overhead; the ~B/2 cap
    # guarantees >= 2 grid steps for large B so dimension_semantics=("parallel",)
    # can shard the batch across both TensorCores on v7x; the 512-row floor
    # avoids chopping small batches into pure overhead on single-TC chips.
    # (block_b can be raised toward 8192 with plenty of VMEM headroom.)
    tb_half = _round_up(-(-B // 2), 8)          # ceil(B/2), 8-aligned
    tb_floor = min(512, _round_up(B, 8))
    tb = max(tb_floor, min(block_b, tb_half))
    grid = (pl.cdiv(B, tb),)                    # ragged last block: no x padding

    out = pl.pallas_call(
        actor_net_kernel,
        out_shape=jax.ShapeDtypeStruct((B, output_dim), jnp.float32),
        grid_spec=pltpu.PrefetchScalarGridSpec(
            num_scalar_prefetch=0,
            grid=grid,
            in_specs=[
                # x: tiled over the batch grid (double-buffered by Pallas)
                pl.BlockSpec((tb, input_dim), lambda i: (i, 0)),
                # weights/biases: constant index_map -> VMEM-resident, 1 DMA each
                pl.BlockSpec((input_dim, h_pad), lambda i: (0, 0)),
                pl.BlockSpec((1, h_pad), lambda i: (0, 0)),
                pl.BlockSpec((h_pad, output_dim), lambda i: (0, 0)),
                pl.BlockSpec((1, output_dim), lambda i: (0, 0)),
            ],
            out_specs=pl.BlockSpec((tb, output_dim), lambda i: (i, 0)),
        ),
        compiler_params=pltpu.CompilerParams(
            dimension_semantics=("parallel",),   # shard batch across TCs (v7x)
            vmem_limit_bytes=32 * 1024 * 1024,   # safe on v5e/v6e/v7x
        ),
    )(x, w1p, b1p, w2p, b2r)
    return out


def init_params(key, input_dim, hidden_dim, output_dim):
    """Deterministic init mirroring torch.nn.Linear default (U(-1/sqrt(fan_in), +))."""
    k1, k2, k3, k4 = jax.random.split(key, 4)
    bound1 = 1.0 / (input_dim ** 0.5)
    bound2 = 1.0 / (hidden_dim ** 0.5)
    # stored as (in, out) = transpose of torch's (out, in) weight layout
    w1 = jax.random.uniform(k1, (input_dim, hidden_dim), jnp.float32, -bound1, bound1)
    b1 = jax.random.uniform(k2, (1, hidden_dim), jnp.float32, -bound1, bound1)
    w2 = jax.random.uniform(k3, (hidden_dim, output_dim), jnp.float32, -bound2, bound2)
    b2 = jax.random.uniform(k4, (1, output_dim), jnp.float32, -bound2, bound2)
    return w1, b1, w2, b2


if __name__ == "__main__":
    # Small shapes consistent with the module (CartPole-ish actor).
    batch, input_dim, hidden_dim, output_dim = 8, 4, 32, 2

    key = jax.random.PRNGKey(0)
    kx, kp = jax.random.split(key)
    x = jax.random.normal(kx, (batch, input_dim), dtype=jnp.float32)
    w1, b1, w2, b2 = init_params(kp, input_dim, hidden_dim, output_dim)

    probs = actor_net_forward(x, w1, b1, w2, b2)
    probs = jax.block_until_ready(probs)

    # Reference check in plain JAX (same math as the torch forward).
    h_ref = jnp.maximum(x @ w1 + b1, 0.0)
    s_ref = h_ref @ w2 + b2
    ref = jax.nn.softmax(s_ref, axis=-1)
    assert probs.shape == (batch, output_dim)
    assert jnp.allclose(probs, ref, atol=1e-5, rtol=1e-5)
    assert jnp.allclose(jnp.sum(probs, axis=-1), 1.0, atol=1e-5)

    # TODO(synk): ActorNet.action() (Categorical sampling + log_prob) is host-side
    # control logic and is intentionally left outside the kernel.
    print("KERNEL_OK")
</pallas_src>

<mosaic_0001>
module attributes {stable_mosaic.version = 11 : i64} {
  func.func @actor_net_kernel(%arg0: i32, %arg1: memref<8x4xf32, #tpu.memory_space<vmem>>, %arg2: memref<4x128xf32, #tpu.memory_space<vmem>>, %arg3: memref<1x128xf32, #tpu.memory_space<vmem>>, %arg4: memref<128x2xf32, #tpu.memory_space<vmem>>, %arg5: memref<1x2xf32, #tpu.memory_space<vmem>>, %arg6: memref<8x2xf32, #tpu.memory_space<vmem>>) attributes {dimension_semantics = [#tpu.dimension_semantics<parallel>], iteration_bounds = array<i64: 1>, scalar_prefetch = 0 : i64, scratch_operands = 0 : i64, tpu.core_type = #tpu.core_type<tc>, window_params = [{transform_indices = @transform_0, window_bounds = array<i64: 8, 4>}, {pipeline_mode = #tpu.pipeline_mode<synchronous>, transform_indices = @transform_1, window_bounds = array<i64: 4, 128>}, {pipeline_mode = #tpu.pipeline_mode<synchronous>, transform_indices = @transform_2, window_bounds = array<i64: 1, 128>}, {pipeline_mode = #tpu.pipeline_mode<synchronous>, transform_indices = @transform_3, window_bounds = array<i64: 128, 2>}, {pipeline_mode = #tpu.pipeline_mode<synchronous>, transform_indices = @transform_4, window_bounds = array<i64: 1, 2>}, {transform_indices = @transform_5, window_bounds = array<i64: 8, 2>}]} {
    %c0 = arith.constant 0 : index
    %c0_0 = arith.constant 0 : index
    %0 = vector.load %arg1[%c0, %c0_0] : memref<8x4xf32, #tpu.memory_space<vmem>>, vector<8x4xf32>
    %c0_1 = arith.constant 0 : index
    %c0_2 = arith.constant 0 : index
    %1 = vector.load %arg2[%c0_1, %c0_2] : memref<4x128xf32, #tpu.memory_space<vmem>>, vector<4x128xf32>
    %cst = arith.constant dense<0.000000e+00> : vector<8x128xf32>
    %2 = tpu.matmul %0, %1, %cst {dimension_numbers = #tpu.dot_dimension_numbers<[1], [0], [0], [1], [0, 0, 1, 1], [], []>} : vector<8x4xf32>, vector<4x128xf32>, vector<8x128xf32> -> vector<8x128xf32>
    %c0_3 = arith.constant 0 : index
    %c0_4 = arith.constant 0 : index
    %3 = vector.load %arg3[%c0_3, %c0_4] : memref<1x128xf32, #tpu.memory_space<vmem>>, vector<1x128xf32>
    %4 = vector.broadcast %3 : vector<1x128xf32> to vector<8x128xf32>
    %5 = arith.addf %2, %4 : vector<8x128xf32>
    %cst_5 = arith.constant 0.000000e+00 : f32
    %6 = vector.broadcast %cst_5 : f32 to vector<8x128xf32>
    %7 = arith.maximumf %5, %6 : vector<8x128xf32>
    %c0_6 = arith.constant 0 : index
    %c0_7 = arith.constant 0 : index
    %8 = vector.load %arg4[%c0_6, %c0_7] : memref<128x2xf32, #tpu.memory_space<vmem>>, vector<128x2xf32>
    %cst_8 = arith.constant dense<0.000000e+00> : vector<8x2xf32>
    %9 = tpu.matmul %7, %8, %cst_8 {dimension_numbers = #tpu.dot_dimension_numbers<[1], [0], [0], [1], [0, 0, 1, 1], [], []>} : vector<8x128xf32>, vector<128x2xf32>, vector<8x2xf32> -> vector<8x2xf32>
    %c0_9 = arith.constant 0 : index
    %c0_10 = arith.constant 0 : index
    %10 = vector.load %arg5[%c0_9, %c0_10] : memref<1x2xf32, #tpu.memory_space<vmem>>, vector<1x2xf32>
    %11 = vector.broadcast %10 : vector<1x2xf32> to vector<8x2xf32>
    %12 = arith.addf %9, %11 : vector<8x2xf32>
    %cst_11 = arith.constant dense<0xFF800000> : vector<8xf32>
    %13 = vector.multi_reduction <maximumf>, %12, %cst_11 [1] : vector<8x2xf32> to vector<8xf32>
    %14 = vector.shape_cast %13 : vector<8xf32> to vector<8x1xf32>
    %15 = vector.broadcast %14 : vector<8x1xf32> to vector<8x2xf32>
    %16 = arith.subf %12, %15 : vector<8x2xf32>
    %17 = math.exp %16 : vector<8x2xf32>
    %cst_12 = arith.constant dense<0.000000e+00> : vector<8xf32>
    %18 = vector.multi_reduction <add>, %17, %cst_12 [1] : vector<8x2xf32> to vector<8xf32>
    %19 = vector.shape_cast %18 : vector<8xf32> to vector<8x1xf32>
    %20 = tpu.reciprocal %19 : vector<8x1xf32> -> vector<8x1xf32>
    %21 = vector.broadcast %20 : vector<8x1xf32> to vector<8x2xf32>
    %22 = arith.mulf %17, %21 : vector<8x2xf32>
    %c0_13 = arith.constant 0 : index
    %c0_14 = arith.constant 0 : index
    %23 = vector.load %arg6[%c0_13, %c0_14] : memref<8x2xf32, #tpu.memory_space<vmem>>, vector<8x2xf32>
    tpu.vector_store %arg6[%c0_13, %c0_14], %22 {strides = array<i32>} : memref<8x2xf32, #tpu.memory_space<vmem>>, vector<8x2xf32>,
    return
  }
  func.func @transform_0(%arg0: i32) -> (i32, i32) {
    %c0_i32 = arith.constant 0 : i32
    %c0_i32_0 = arith.constant 0 : i32
    return %arg0, %c0_i32 : i32, i32
  }
  func.func @transform_1(%arg0: i32) -> (i32, i32) {
    %c0_i32 = arith.constant 0 : i32
    %c0_i32_0 = arith.constant 0 : i32
    %c0_i32_1 = arith.constant 0 : i32
    return %c0_i32, %c0_i32_0 : i32, i32
  }
  func.func @transform_2(%arg0: i32) -> (i32, i32) {
    %c0_i32 = arith.constant 0 : i32
    %c0_i32_0 = arith.constant 0 : i32
    %c0_i32_1 = arith.constant 0 : i32
    return %c0_i32, %c0_i32_0 : i32, i32
  }
  func.func @transform_3(%arg0: i32) -> (i32, i32) {
    %c0_i32 = arith.constant 0 : i32
    %c0_i32_0 = arith.constant 0 : i32
    %c0_i32_1 = arith.constant 0 : i32
    return %c0_i32, %c0_i32_0 : i32, i32
  }
  func.func @transform_4(%arg0: i32) -> (i32, i32) {
    %c0_i32 = arith.constant 0 : i32
    %c0_i32_0 = arith.constant 0 : i32
    %c0_i32_1 = arith.constant 0 : i32
    return %c0_i32, %c0_i32_0 : i32, i32
  }
  func.func @transform_5(%arg0: i32) -> (i32, i32) {
    %c0_i32 = arith.constant 0 : i32
    %c0_i32_0 = arith.constant 0 : i32
    return %arg0, %c0_i32 : i32, i32
  }
}

</mosaic_0001>

<bundles_post_ra>
// kernel: tpu_custom_call.1
= control target key start
LH: loop header
LB: loop body
LE: loop exit
PB: predicated region body
PF: predicated region fallthrough
CT: control target
= control target key end

     0   :  { %vm33_vm0 = vcmask 1043456   ;;  %vm29_vm1 = vcmask 31744   ;;  %v312_v0 = vmov 0.0   ;;  %vm313_vm2 = vmmov 0   ;;  %s411_s1 = inlined_call_operand.vmem [shape: f32[4,128], index: 1, kind: input, shape index: {}]   ;;  %s412_s0 = inlined_call_operand.vmem [shape: f32[8,4], index: 0, kind: input, shape index: {}]   ;;  %s413_s3 = inlined_call_operand.vmem [shape: f32[128,2], index: 3, kind: input, shape index: {}]   ;;  %s414_s2 = inlined_call_operand.vmem [shape: f32[1,128], index: 2, kind: input, shape index: {}]   ;;  %s415_s4 = inlined_call_operand.vmem [shape: f32[1,2], index: 4, kind: input, shape index: {}]   ;;  %s416_s5 = inlined_call_operand.vmem [shape: f32[8,2], index: 5, kind: output, shape index: {}]  }
   0x1   :  { %241 = vmatprep.subr.mxu0 %v312_v0  ;;  %v21_v1 = vld [vmem:[%s411_s1] sm:$0xf]  ;;  %243 = vmatprep.mubr.msk.f32.mxu0 %vm313_vm2, %v312_v0  ;;  %v314_v4 = vmov 0.0|0.0   ;;  %v109_v5 = vld [vmem:[%s413_s3 + $0x8] sm:$0xff]  ;;  %v110_v6 = vld [vmem:[%s413_s3 + $0x10] sm:$0xff]  ;;  %vm201_vm3 = vcmask 15360  }
   0x2   :  { %v20_v2 = vld [vmem:[%s412_s0] sm:$0xff]  ;;  %242 = vmatpush3.msk.msra.mxu0 %vm33_vm0, %v21_v1  ;;  %281 = vmatprep.subr.bf16.mxu1 %v314_v4  ;;  %v111_v7 = vld [vmem:[%s413_s3 + $0x18] sm:$0xff]  ;;  %v113_v11 = vld [vmem:[%s413_s3 + $0x28] sm:$0xff] }
   0x3   :  { %v108_v3 = vld [vmem:[%s413_s3] sm:$0xff]  ;;  %244 = vmatmul.mubr.msk.f32.vlgmr.msra.gmra.mrb[0].mxu0 %vm29_vm1, %v20_v2  ;;  %278 = vmatprep.mubr.msk.f32.mxu1 %vm313_vm2, %v312_v0  ;;  %v285_v9 = vpack.c.bf16 %v111_v7, %v110_v6  ;;  %v114_v13 = vld [vmem:[%s413_s3 + $0x30] sm:$0xff]  ;;  %v115_v14 = vld [vmem:[%s413_s3 + $0x38] sm:$0xff] }
   0x4   :  { %v282_v8 = vpack.c.bf16 %v109_v5, %v108_v3  ;;  %v112_v10 = vld [vmem:[%s413_s3 + $0x20] sm:$0xff]  ;;  %v291_v15 = vpack.c.bf16 %v115_v14, %v114_v13  ;;  %v117_v17 = vld [vmem:[%s413_s3 + $0x48] sm:$0xff]  ;;  %v118_v19 = vld [vmem:[%s413_s3 + $0x50] sm:$0xff] }
   0x5   :  { %v288_v12 = vpack.c.bf16 %v113_v11, %v112_v10  ;;  %v116_v16 = vld [vmem:[%s413_s3 + $0x40] sm:$0xff]  ;;  %v119_v20 = vld [vmem:[%s413_s3 + $0x58] sm:$0xff]  ;;  %v121_v23 = vld [vmem:[%s413_s3 + $0x68] sm:$0xff] }
   0x6   :  { %283 = vmatpush3.bf16.msra.mxu1 %v282_v8  ;;  %v294_v18 = vpack.c.bf16 %v117_v17, %v116_v16  ;;  %v297_v21 = vpack.c.bf16 %v119_v20, %v118_v19  ;;  %v120_v22 = vld [vmem:[%s413_s3 + $0x60] sm:$0xff]  ;;  %v122_v25 = vld [vmem:[%s413_s3 + $0x70] sm:$0xff]  ;;  %v123_v26 = vld [vmem:[%s413_s3 + $0x78] sm:$0xff] }
   0x7   :  { %284 = vmatprep.subr.bf16.mxu1 %v314_v4  ;;  %v300_v24 = vpack.c.bf16 %v121_v23, %v120_v22  ;;  %v303_v27 = vpack.c.bf16 %v123_v26, %v122_v25  ;;  %v218_v28 = vld [vmem:[%s414_s2] ss:$0 sm:$0xff] }
   0x8   :  { %v221_v33 = vld [vmem:[%s415_s4] ss:$0 sm:$0xff] }
   0xa   :  { %286 = vmatpush3.bf16.msra.mxu1 %v285_v9 }
   0xb   :  { %287 = vmatprep.subr.bf16.mxu1 %v314_v4 }
   0xe   :  { %289 = vmatpush3.bf16.msra.mxu1 %v288_v12 }
   0xf   :  { %290 = vmatprep.subr.bf16.mxu1 %v314_v4 }
  0x12   :  { %292 = vmatpush3.bf16.msra.mxu1 %v291_v15 }
  0x13   :  { %293 = vmatprep.subr.bf16.mxu1 %v314_v4 }
  0x16   :  { %295 = vmatpush3.bf16.msra.mxu1 %v294_v18 }
  0x17   :  { %296 = vmatprep.subr.bf16.mxu1 %v314_v4 }
  0x1a   :  { %298 = vmatpush3.bf16.msra.mxu1 %v297_v21 }
  0x1b   :  { %299 = vmatprep.subr.bf16.mxu1 %v314_v4 }
  0x1e   :  { %301 = vmatpush3.bf16.msra.mxu1 %v300_v24 }
  0x1f   :  { %302 = vmatprep.subr.bf16.mxu1 %v314_v4 }
  0x22   :  { %304 = vmatpush3.bf16.msra.mxu1 %v303_v27 }
  0xd6   :  { %v103_v29 = vpop.f32.mrb[0].mxu0 }
  0xd7   :  { %v104_v30 = vadd.f32 %v218_v28, %v103_v29  ;;  %v245_v31 = vpop.f32.mrb[1].mxu0 }
  0xd9   :  { %v107_v32 = vmax.f32 %v104_v30, 0.0 }
  0xdb   :  { %279 = vmatmul.mubr.f32.vlgmr.msra.gmra.mrb[0].mxu1 %v107_v32 }
 0x1ae   :  { %v197_v34 = vpop.f32.mrb[0].mxu1 }
 0x1af   :  { %v198_v35 = vadd.f32 %v221_v33, %v197_v34  ;;  %v280_v36 = vpop.f32.mrb[1].mxu1 }
 0x1b1   :  { %v202_v37 = vsel %vm201_vm3, %v198_v35, -inf }
 0x1b2   :  { %203 = vmax.xlane.f32.xlu0 %v202_v37 }
 0x23f   :  { %v204_v38 = vpop.xlane.xlu0 %203 }
 0x240   :  { %v205_v39 = vsub.f32 %v198_v35, %v204_v38 }
 0x242   :  { %v206_v40 = vmul.f32 1.442695, %v205_v39 }
 0x244   :  { %308 = vpow2.f32 %v206_v40 }
 0x24e   :  { %v309_v41 = vpop.eup %308 }
 0x24f   :  { %v208_v42 = vsel %vm201_vm3, %v309_v41, 0.0 }
 0x250   :  { %209 = vadd.xlane.f32.xlu0 %v208_v42 }
 0x2dd   :  { %v210_v43 = vpop.xlane.xlu0 %209 }
 0x2de   :  { %310 = vrcp.f32 %v210_v43 }
 0x2e8   :  { %v311_v44 = vpop.eup %310 }
 0x2e9   :  { %v212_v45 = vmul.f32 %v311_v44, %v309_v41 }
 0x2eb   :  { %213 = vst.msk [vmem:[%s416_s5] sm:$0xff] %vm201_vm3, %v212_v45 }

</bundles_post_ra>
